<compile_context>
chip_gen: v5e
topology: v5e:2x2
jax: 0.10.0
libtpu: 0.0.40
codegen_flags: <defaults>
</compile_context>

<pallas_src>
import jax
import jax.numpy as jnp
from jax.experimental import pallas as pl
from jax.experimental.pallas import tpu as pltpu  # noqa: F401  (TPU backend)


def center_attention_kernel(x_ref, out_ref):
    # Forward semantics of CenterAttention: return x unchanged.
    # (The PyTorch `y = x + x[:, L//2 + 1, :]` is dead code and intentionally
    #  not reproduced -- it cannot affect the output.)
    out_ref[...] = x_ref[...]


def center_attention(x):
    """x: [B, L, D] float array. Returns x (identity), via a single-step Pallas copy."""
    B, L, D = x.shape

    # Parity with PyTorch: the original forward indexes x[:, L//2 + 1, :] and
    # raises if that row does not exist (e.g. L <= 2), even though the result
    # is discarded.  Mirror that shape-time check here.
    if L // 2 + 1 >= L:
        raise IndexError(
            f"index {L // 2 + 1} is out of bounds for dimension 1 with size {L}")

    total = B * L * D
    if total % 128 == 0:
        # Lane- AND sublane-dense slab: contiguous bytes, free reshape.
        x2 = x.reshape(total // 128, 128)
    else:
        # Fallback: at least lane-dense along the flattened tail.
        x2 = x.reshape(B, L * D)

    out = pl.pallas_call(
        center_attention_kernel,
        out_shape=jax.ShapeDtypeStruct(x2.shape, x2.dtype),
        # No grid: a single invocation over the whole (tiny) array -- avoids
        # per-grid-step overhead (~0.35 us/step) dominating a 2 KiB copy.
        in_specs=[pl.BlockSpec(x2.shape, lambda: (0,) * x2.ndim)],
        out_specs=pl.BlockSpec(x2.shape, lambda: (0,) * x2.ndim),
        # Identity copy: let the output alias the input HBM buffer.
        input_output_aliases={0: 0},
        # Tell XLA's scheduler this custom call is tiny and memory-only.
        cost_estimate=pl.CostEstimate(
            flops=0,
            transcendentals=0,
            bytes_accessed=2 * total * x.dtype.itemsize),
    )(x2)
    return out.reshape(B, L, D)


if __name__ == "__main__":
    B, L, D = 2, 8, 32
    key = jax.random.PRNGKey(0)
    x = jax.random.normal(key, (B, L, D), jnp.float32)

    out = center_attention(x)
    out = jax.block_until_ready(out)

    # Reference: the PyTorch forward returns x unchanged (the `y` computation
    # is discarded), so the expected output is exactly the input.
    assert out.shape == (B, L, D)
    assert jnp.array_equal(out, x), "CenterAttention forward must be identity"

    print("KERNEL_OK")
</pallas_src>

<mosaic_0001>
module attributes {stable_mosaic.version = 11 : i64} {
  func.func @center_attention_kernel(%arg0: memref<4x128xf32, #tpu.memory_space<vmem>>, %arg1: memref<4x128xf32, #tpu.memory_space<vmem>>) attributes {dimension_semantics = [], scalar_prefetch = 0 : i64, scratch_operands = 0 : i64, tpu.core_type = #tpu.core_type<tc>} {
    %c0 = arith.constant 0 : index
    %c0_0 = arith.constant 0 : index
    %0 = vector.load %arg0[%c0, %c0_0] : memref<4x128xf32, #tpu.memory_space<vmem>>, vector<4x128xf32>
    %c0_1 = arith.constant 0 : index
    %c0_2 = arith.constant 0 : index
    %1 = vector.load %arg1[%c0_1, %c0_2] : memref<4x128xf32, #tpu.memory_space<vmem>>, vector<4x128xf32>
    tpu.vector_store %arg1[%c0_1, %c0_2], %0 {strides = array<i32>} : memref<4x128xf32, #tpu.memory_space<vmem>>, vector<4x128xf32>,
    return
  }
}

</mosaic_0001>

<bundles_post_ra>
// kernel: tpu_custom_call.1
= control target key start
LH: loop header
LB: loop body
LE: loop exit
PB: predicated region body
PF: predicated region fallthrough
CT: control target
= control target key end

     0   :  { %6 = vsyncpa [#allocation3], 0  ;;  %s114_s0 = inlined_call_operand.hbm [shape: f32[4,128], index: 0, kind: input, shape index: {}, may-alias: {0,1}]   ;;  %s115_s1 = inlined_call_operand.hbm [shape: f32[4,128], index: 1, kind: output, shape index: {}, may-alias: {0,1}]  }
   0x1   :  { %7 = vsyncpa [#allocation4], 0  ;;  %s13_s8 = sshll.u32 %s114_s0, 4  ;;  %s96_s9 = smov [#allocation2]   ;;  %s14_s8 = int_to_ptr.hbm [resolvable:$true] %s13_s8 }
   0x2   :  { %s15_s10 = sshll.u32 %s96_s9, 4  ;;  %s16_s10 = int_to_ptr.vmem [resolvable:$true] %s15_s10 }
   0x3   :  { %18 = dma.hbm_to_vmem [thread:$0]  %s14_s8, 64, %s16_s10, [#allocation3]  }
   0x4   :  { %92 = dma.done.wait [#allocation3], 64  }
   0x5   :  { %93 = vsyncadd [#allocation3], 4294967232  ;;  %s97_s11 = smov [#allocation5]   ;;  %s32_s15 = sshll.u32 %s115_s1, 4  ;;  %v23_v0 = vld [vmem:[#allocation2] sm:$0xf]  ;;  %s33_s15 = int_to_ptr.hbm [resolvable:$true] %s32_s15 }
   0x6   :  { %s30_s12 = sshll.u32 %s97_s11, 4  ;;  %24 = vst [vmem:[#allocation5] sm:$0xf] %v23_v0  ;;  %s31_s12 = int_to_ptr.vmem [resolvable:$true] %s30_s12 }
   0x7   :  { %35 = dma.vmem_to_hbm [thread:$0]  %s31_s12, 64, %s33_s15, [#allocation4]  }
   0x8   :  { %94 = dma.done.wait [#allocation4], 64  }
   0x9   :  { %95 = vsyncadd [#allocation4], 4294967232 }
   0xa   :  { %40 = vsyncpa [#allocation3], 1 }
   0xb   :  { %41 = vsyncpa [#allocation4], 1 }

</bundles_post_ra>
